<compile_context>
chip_gen: v5e
topology: v5e:2x2
jax: 0.10.0
libtpu: 0.0.40
codegen_flags: <defaults>
</compile_context>

<pallas_src>
import functools

import jax
import jax.numpy as jnp
from jax.experimental import pallas as pl
from jax.experimental.pallas import tpu as pltpu


def _round_up(x, m):
    return ((x + m - 1) // m) * m


def _divisor_tile(total, align, cap):
    """Largest multiple of `align` that divides `total` and is <= cap (or None)."""
    t = (min(cap, total) // align) * align
    while t >= align:
        if total % t == 0:
            return t
        t -= align
    return None


def _pick_tile(total, align, cap):
    """Tile size: multiple of `align`, <= cap; prefers exact divisors of
    `total` (>= cap/2) to avoid zero-padded ragged tiles."""
    cap = max(align, (cap // align) * align)
    if total <= cap:
        return total
    d = _divisor_tile(total, align, cap)
    if d is not None and 2 * d >= cap:
        return d
    return cap


def _ssdp_kernel(post_t_ref, pre_ref, chi_ref, clo_ref, out_ref, *, inv_b):
    k = pl.program_id(2)

    @pl.when(k == 0)
    def _init():
        out_ref[...] = jnp.zeros_like(out_ref)

    # {0,1} spikes shipped narrow (int8/bf16); upcast to bf16 on the VPU.
    post = post_t_ref[...].astype(jnp.bfloat16)       # [to, bt]
    pre = pre_ref[...].astype(jnp.bfloat16)           # [bt, ti]

    # Per-batch coefficient as a bf16 hi/lo pair: batch is the LANE axis of
    # the [to, bt] operand, so the [1, bt] rows broadcast cheaply along
    # sublanes.  With post in {0,1}, post*c_hi / post*c_lo are exact bf16
    # values, so two bf16 MXU matmuls (f32 accumulation) reproduce the f32
    # weighted sum to ~2^-18 relative error.
    w_hi = post * chi_ref[...]                        # [to, bt] bf16
    w_lo = post * clo_ref[...]                        # [to, bt] bf16

    acc = jnp.dot(w_hi, pre, preferred_element_type=jnp.float32)
    acc = acc + jnp.dot(w_lo, pre, preferred_element_type=jnp.float32)
    out_ref[...] += acc                               # f32, VMEM-resident over k

    @pl.when(k == pl.num_programs(2) - 1)
    def _finalize():
        # Mean over the TRUE batch size + clip, only after the full sum.
        out_ref[...] = jnp.clip(out_ref[...] * inv_b, -1.0, 1.0)


@functools.partial(
    jax.jit,
    static_argnames=("a_plus", "a_minus", "tau_plus", "tau_minus",
                     "tile_o", "tile_i", "tile_b", "binary_spikes"))
def ssdp_forward(pre_spike, post_spike, delta_t,
                 a_plus=0.02, a_minus=0.02, tau_plus=20.0, tau_minus=20.0,
                 tile_o=512, tile_i=1024, tile_b=512, binary_spikes=True):
    """Pallas-backed SSDPModule.forward. Returns delta_w of shape [O, I]."""
    B, I = pre_spike.shape
    B2, O = post_spike.shape
    assert B2 == B and delta_t.shape == (B, 1)

    a_plus = float(a_plus)
    a_minus = float(a_minus)
    tau_plus = float(tau_plus)
    tau_minus = float(tau_minus)

    # ---- tile / pad derivation -------------------------------------------
    # Batch (contraction) axis: lane dim of post^T and sublane dim of pre.
    b_pad = _round_up(B, 128)
    bt = _pick_tile(b_pad, 128, tile_b)
    b_pad = _round_up(b_pad, bt)

    # I axis: lane dim of pre and of the output.
    i_pad = _round_up(I, 128)
    ti = _pick_tile(i_pad, 128, tile_i)
    i_pad = _round_up(i_pad, ti)

    # O axis: sublane dim of post^T (int8 -> multiple of 32) and of output.
    o_pad = _round_up(O, 32)
    to = _pick_tile(o_pad, 32, tile_o)
    o_pad = _round_up(o_pad, to)

    # v7x has two TensorCores: make sure the ("parallel","parallel") sub-grid
    # has >= 2 blocks so both cores get work (no-op on single-TC v5e/v6e).
    if (o_pad // to) * (i_pad // ti) < 2:
        ti_s = _divisor_tile(i_pad, 128, i_pad // 2) if i_pad >= 256 else None
        if ti_s is not None:
            ti = ti_s
        else:
            to_s = _divisor_tile(o_pad, 32, o_pad // 2) if o_pad >= 64 else None
            if to_s is not None:
                to = to_s

    grid = (o_pad // to, i_pad // ti, b_pad // bt)

    # ---- pad + pack inputs (zero padding contributes nothing to the sum) ---
    # Spikes are {0,1} -> int8 is exact and halves HBM traffic vs bf16.
    # Set binary_spikes=False for non-binary (graded) inputs.
    spike_dtype = jnp.int8 if binary_spikes else jnp.bfloat16
    pre_p = jnp.pad(pre_spike, ((0, b_pad - B), (0, i_pad - I))).astype(spike_dtype)
    post_t = jnp.pad(post_spike,
                     ((0, b_pad - B), (0, o_pad - O))).astype(spike_dtype).T

    # Per-batch coefficient computed ONCE here (incl. both exps), then split
    # into lane-dense bf16 hi/lo rows for the exact bf16-MXU path.
    dt = jnp.pad(delta_t.astype(jnp.float32).reshape(B), (0, b_pad - B))
    coef = (a_plus * jnp.exp(-(dt / tau_plus))
            - a_minus * jnp.exp(-(dt / tau_plus) / tau_minus))        # [Bp] f32
    c_hi = coef.astype(jnp.bfloat16)
    c_lo = (coef - c_hi.astype(jnp.float32)).astype(jnp.bfloat16)
    c_hi = c_hi.reshape(1, b_pad)
    c_lo = c_lo.reshape(1, b_pad)

    kernel = functools.partial(_ssdp_kernel, inv_b=1.0 / float(B))

    out = pl.pallas_call(
        kernel,
        out_shape=jax.ShapeDtypeStruct((o_pad, i_pad), jnp.float32),
        grid_spec=pltpu.PrefetchScalarGridSpec(
            num_scalar_prefetch=0,
            grid=grid,
            in_specs=[
                pl.BlockSpec((to, bt), lambda i, j, k: (i, k)),    # post^T
                pl.BlockSpec((bt, ti), lambda i, j, k: (k, j)),    # pre
                pl.BlockSpec((1, bt), lambda i, j, k: (0, k)),     # coef hi
                pl.BlockSpec((1, bt), lambda i, j, k: (0, k)),     # coef lo
            ],
            out_specs=pl.BlockSpec((to, ti), lambda i, j, k: (i, j)),
        ),
        compiler_params=pltpu.CompilerParams(
            dimension_semantics=("parallel", "parallel", "arbitrary"),
            vmem_limit_bytes=32 * 1024 * 1024),
        cost_estimate=pl.CostEstimate(
            flops=4 * B * O * I,            # two bf16 matmuls
            transcendentals=0,              # exps hoisted to the wrapper
            bytes_accessed=B * I + B * O + 4 * b_pad + 4 * O * I),
    )(post_t, pre_p, c_hi, c_lo)

    return out[:O, :I]


def _ssdp_reference(pre_spike, post_spike, delta_t,
                    a_plus=0.02, a_minus=0.02, tau_plus=20.0, tau_minus=20.0):
    """Pure-JAX transcription of the PyTorch forward, for verification."""
    post_e = post_spike[:, :, None]                 # [B, O, 1]
    pre_e = pre_spike[:, None, :]                   # [B, 1, I]
    dt_e = (delta_t / tau_plus)[:, :, None]         # [B, 1, 1]
    dw_pot = a_plus * post_e * pre_e * jnp.exp(-dt_e)
    dw_dep = a_minus * post_e * pre_e * jnp.exp(-dt_e / tau_minus)
    dw = (dw_pot - dw_dep).mean(axis=0)
    return jnp.clip(dw, -1.0, 1.0)


if __name__ == "__main__":
    B, INPUT_DIM, OUTPUT_DIM = 300, 256, 48

    key = jax.random.PRNGKey(0)
    k1, k2, k3 = jax.random.split(key, 3)
    pre_spike = jax.random.bernoulli(k1, 0.3, (B, INPUT_DIM)).astype(jnp.float32)
    post_spike = jax.random.bernoulli(k2, 0.3, (B, OUTPUT_DIM)).astype(jnp.float32)
    delta_t = jax.random.uniform(k3, (B, 1), minval=0.0, maxval=50.0,
                                 dtype=jnp.float32)

    dw_ref = _ssdp_reference(pre_spike, post_spike, delta_t)

    # 1) Default (large) tiles: single batch tile, parallel-split keeps the
    #    (O, I) grid at >= 2 blocks for v7x's two TensorCores.
    dw = ssdp_forward(pre_spike, post_spike, delta_t)
    jax.block_until_ready(dw)
    assert dw.shape == (OUTPUT_DIM, INPUT_DIM)
    assert jnp.allclose(dw, dw_ref, atol=2e-6, rtol=1e-5), "mismatch (default tiles)"

    # 2) Small tile overrides: exercises the full 3-D grid (2, 2, 3) with
    #    in-place accumulation into the resident output block over k.
    dw2 = ssdp_forward(pre_spike, post_spike, delta_t,
                       tile_o=32, tile_i=128, tile_b=128)
    jax.block_until_ready(dw2)
    assert jnp.allclose(dw2, dw_ref, atol=2e-6, rtol=1e-5), "mismatch (small tiles)"

    print("KERNEL_OK")
</pallas_src>

<mosaic_0001>
module attributes {stable_mosaic.version = 11 : i64} {
  func.func @_ssdp_kernel(%arg0: i32, %arg1: i32, %arg2: i32, %arg3: memref<64x384xi8, #tpu.memory_space<vmem>>, %arg4: memref<384x128xi8, #tpu.memory_space<vmem>>, %arg5: memref<1x384xbf16, #tpu.memory_space<vmem>>, %arg6: memref<1x384xbf16, #tpu.memory_space<vmem>>, %arg7: memref<64x128xf32, #tpu.memory_space<vmem>>) attributes {dimension_semantics = [#tpu.dimension_semantics<parallel>, #tpu.dimension_semantics<parallel>, #tpu.dimension_semantics<arbitrary>], iteration_bounds = array<i64: 1, 2, 1>, scalar_prefetch = 0 : i64, scratch_operands = 0 : i64, tpu.core_type = #tpu.core_type<tc>, window_params = [{transform_indices = @transform_0, window_bounds = array<i64: 64, 384>}, {transform_indices = @transform_1, window_bounds = array<i64: 384, 128>}, {transform_indices = @transform_2, window_bounds = array<i64: 1, 384>}, {transform_indices = @transform_3, window_bounds = array<i64: 1, 384>}, {transform_indices = @transform_4, window_bounds = array<i64: 64, 128>}]} {
    %c0_i32 = arith.constant 0 : i32
    %0 = arith.cmpi eq, %arg2, %c0_i32 : i32
    %1 = arith.extui %0 : i1 to i32
    %c0_i32_0 = arith.constant 0 : i32
    %2 = arith.cmpi ne, %1, %c0_i32_0 : i32
    scf.if %2 {
      %cst_15 = arith.constant 0.000000e+00 : f32
      %22 = vector.broadcast %cst_15 : f32 to vector<64x128xf32>
      %c0_16 = arith.constant 0 : index
      %c0_17 = arith.constant 0 : index
      %23 = vector.load %arg7[%c0_16, %c0_17] : memref<64x128xf32, #tpu.memory_space<vmem>>, vector<64x128xf32>
      tpu.vector_store %arg7[%c0_16, %c0_17], %22 {strides = array<i32>} : memref<64x128xf32, #tpu.memory_space<vmem>>, vector<64x128xf32>,
    } else {
    }
    %c0 = arith.constant 0 : index
    %c0_1 = arith.constant 0 : index
    %3 = vector.load %arg3[%c0, %c0_1] : memref<64x384xi8, #tpu.memory_space<vmem>>, vector<64x384xi8>
    %4 = arith.sitofp %3 : vector<64x384xi8> to vector<64x384xbf16>
    %c0_2 = arith.constant 0 : index
    %c0_3 = arith.constant 0 : index
    %5 = vector.load %arg4[%c0_2, %c0_3] : memref<384x128xi8, #tpu.memory_space<vmem>>, vector<384x128xi8>
    %6 = arith.sitofp %5 : vector<384x128xi8> to vector<384x128xbf16>
    %c0_4 = arith.constant 0 : index
    %c0_5 = arith.constant 0 : index
    %7 = vector.load %arg5[%c0_4, %c0_5] : memref<1x384xbf16, #tpu.memory_space<vmem>>, vector<1x384xbf16>
    %8 = vector.broadcast %7 : vector<1x384xbf16> to vector<64x384xbf16>
    %9 = arith.mulf %4, %8 : vector<64x384xbf16>
    %c0_6 = arith.constant 0 : index
    %c0_7 = arith.constant 0 : index
    %10 = vector.load %arg6[%c0_6, %c0_7] : memref<1x384xbf16, #tpu.memory_space<vmem>>, vector<1x384xbf16>
    %11 = vector.broadcast %10 : vector<1x384xbf16> to vector<64x384xbf16>
    %12 = arith.mulf %4, %11 : vector<64x384xbf16>
    %cst = arith.constant dense<0.000000e+00> : vector<64x128xf32>
    %13 = tpu.matmul %9, %6, %cst {dimension_numbers = #tpu.dot_dimension_numbers<[1], [0], [0], [1], [0, 0, 1, 1], [], []>} : vector<64x384xbf16>, vector<384x128xbf16>, vector<64x128xf32> -> vector<64x128xf32>
    %cst_8 = arith.constant dense<0.000000e+00> : vector<64x128xf32>
    %14 = tpu.matmul %12, %6, %cst_8 {dimension_numbers = #tpu.dot_dimension_numbers<[1], [0], [0], [1], [0, 0, 1, 1], [], []>} : vector<64x384xbf16>, vector<384x128xbf16>, vector<64x128xf32> -> vector<64x128xf32>
    %15 = arith.addf %13, %14 : vector<64x128xf32>
    %c0_9 = arith.constant 0 : index
    %c0_10 = arith.constant 0 : index
    %16 = vector.load %arg7[%c0_9, %c0_10] : memref<64x128xf32, #tpu.memory_space<vmem>>, vector<64x128xf32>
    %17 = arith.addf %16, %15 : vector<64x128xf32>
    %c0_11 = arith.constant 0 : index
    %c0_12 = arith.constant 0 : index
    %18 = vector.load %arg7[%c0_11, %c0_12] : memref<64x128xf32, #tpu.memory_space<vmem>>, vector<64x128xf32>
    tpu.vector_store %arg7[%c0_11, %c0_12], %17 {strides = array<i32>} : memref<64x128xf32, #tpu.memory_space<vmem>>, vector<64x128xf32>,
    %c0_i32_13 = arith.constant 0 : i32
    %19 = arith.cmpi eq, %arg2, %c0_i32_13 : i32
    %20 = arith.extui %19 : i1 to i32
    %c0_i32_14 = arith.constant 0 : i32
    %21 = arith.cmpi ne, %20, %c0_i32_14 : i32
    scf.if %21 {
      %c0_15 = arith.constant 0 : index
      %c0_16 = arith.constant 0 : index
      %22 = vector.load %arg7[%c0_15, %c0_16] : memref<64x128xf32, #tpu.memory_space<vmem>>, vector<64x128xf32>
      %cst_17 = arith.constant 0.00333333341 : f32
      %23 = vector.broadcast %cst_17 : f32 to vector<64x128xf32>
      %24 = arith.mulf %22, %23 : vector<64x128xf32>
      %cst_18 = arith.constant -1.000000e+00 : f32
      %cst_19 = arith.constant 1.000000e+00 : f32
      %25 = vector.broadcast %cst_18 : f32 to vector<64x128xf32>
      %26 = arith.maximumf %25, %24 : vector<64x128xf32>
      %27 = vector.broadcast %cst_19 : f32 to vector<64x128xf32>
      %28 = arith.minimumf %27, %26 : vector<64x128xf32>
      %c0_20 = arith.constant 0 : index
      %c0_21 = arith.constant 0 : index
      %29 = vector.load %arg7[%c0_20, %c0_21] : memref<64x128xf32, #tpu.memory_space<vmem>>, vector<64x128xf32>
      tpu.vector_store %arg7[%c0_20, %c0_21], %28 {strides = array<i32>} : memref<64x128xf32, #tpu.memory_space<vmem>>, vector<64x128xf32>,
    } else {
    }
    return
  }
  func.func @transform_0(%arg0: i32, %arg1: i32, %arg2: i32) -> (i32, i32) {
    %c0_i32 = arith.constant 0 : i32
    return %arg0, %arg2 : i32, i32
  }
  func.func @transform_1(%arg0: i32, %arg1: i32, %arg2: i32) -> (i32, i32) {
    %c0_i32 = arith.constant 0 : i32
    return %arg2, %arg1 : i32, i32
  }
  func.func @transform_2(%arg0: i32, %arg1: i32, %arg2: i32) -> (i32, i32) {
    %c0_i32 = arith.constant 0 : i32
    %c0_i32_0 = arith.constant 0 : i32
    return %c0_i32, %arg2 : i32, i32
  }
  func.func @transform_3(%arg0: i32, %arg1: i32, %arg2: i32) -> (i32, i32) {
    %c0_i32 = arith.constant 0 : i32
    %c0_i32_0 = arith.constant 0 : i32
    return %c0_i32, %arg2 : i32, i32
  }
  func.func @transform_4(%arg0: i32, %arg1: i32, %arg2: i32) -> (i32, i32) {
    %c0_i32 = arith.constant 0 : i32
    return %arg0, %arg1 : i32, i32
  }
}

</mosaic_0001>

<bundles_post_ra>
// kernel: ssdp_forward.1
= control target key start
LH: loop header
LB: loop body
LE: loop exit
PB: predicated region body
PF: predicated region fallthrough
CT: control target
= control target key end

     0   :  { %s1301_s15 = smov 0   ;;  %s1303_s16 = smov 0   ;;  %s1742_s0 = inlined_call_operand.vmem [shape: s8[64,384], index: 0, kind: input, shape index: {}]   ;;  %s1743_s1 = inlined_call_operand.vmem [shape: s8[384,256], index: 1, kind: input, shape index: {}]   ;;  %s1744_s2 = inlined_call_operand.vmem [shape: bf16[1,384], index: 2, kind: input, shape index: {}]   ;;  %s1745_s3 = inlined_call_operand.vmem [shape: bf16[1,384], index: 3, kind: input, shape index: {}]   ;;  %s1746_s4 = inlined_call_operand.vmem [shape: f32[64,256], index: 4, kind: output, shape index: {}]  }
   0x1   :  { %s1305_s17 = smov 0   ;;  %s1307_s18 = smov 0  }
   0x2   :  { %s1309_s19 = smov 0  }
   0x3 LB: > { %s29_s20 = sadd.s32 1, %s1270_s18  ;;  %s1155_s21 = sadd.s32 4294967295, %s1274_s19   ;;  %s1274_s19 = sphi %s1309_s19, %s14_s19   ;;  %s1270_s18 = sphi %s1307_s18, %s1759_s18   ;;  %s1266_s17 = sphi %s1305_s17, %s1758_s17   ;;  %s1262_s16 = sphi %s1303_s16, %s1757_s16   ;;  %s1258_s15 = sphi %s1301_s15, %s1756_s15  }
   0x4   : > { %p31_p0 = scmp.ge.s32.totalorder %s29_s20, 2  ;;  %p77_p1 = scmp.ne.s32.totalorder %s1262_s16, %s1258_s15 }
   0x5   : > { %p78_p2 = scmp.eq.s32.totalorder %s1274_s19, 0  ;;  %p161_p4 = scmp.eq.s32.totalorder %s1155_s21, 1 }
   0x6   : > { %s1761_s20 = smov (%p31_p0, %s29_s20), 0  ;;  %s70_s23 = sadd.s32 1, %s1262_s16 }
   0x7   : > { %p79_p3 = por %p78_p2, %p77_p1  ;;  %s66_s22 = ssub.s32 %s1270_s18, %s1761_s20 }
   0x8   : > { %p68_p5 = scmp.eq.s32.totalorder %s66_s22, 0  ;;  %p1336_p6 = por %p161_p4, %p77_p1 }
   0x9   : > { %p1161_p7 = scmp.ge.s32.totalorder %s1274_s19, 2 }
   0xa   : > { %s1341_s25 = scalar_select %p68_p5, %s1262_s16, %s70_s23  }
   0xb   : > { %214 = sbr.rel (%p1161_p7) target bundleno = 32 (0x20), region = 28 }
  0x10   : > { %217 = sbr.rel (!%p79_p3) target bundleno = 32 (0x20), region = 32  ;;  %s219_s26 = sand.u32 (%p79_p3), 1, %s1262_s16  }
  0x11   : > { %s1162_s27 = sshll.u32 (%p79_p3), %s1270_s18, 3  ;;  %s1193_s28 = smul.u32 (%p79_p3), 96, %s219_s26 }
  0x12   : > { %s226_s5 = scalar_lea.vmem (%p79_p3), %s1743_s1, %s1162_s27 }
  0x13   : > { %v277_v0 = vld [vmem:[%s226_s5] sm:$0xff] (%p79_p3)  ;;  %v279_v1 = vld [vmem:[%s226_s5 + $0x10] sm:$0xff] (%p79_p3)  ;;  %s221_s6 = scalar_lea.vmem (%p79_p3), [#allocation2], %s1193_s28 }
  0x14   : > { %v281_v2 = vld [vmem:[%s226_s5 + $0x20] sm:$0xff] (%p79_p3)  ;;  %278 = vst [vmem:[%s221_s6] sm:$0xff] (%p79_p3), %v277_v0  ;;  %v283_v3 = vld [vmem:[%s226_s5 + $0x30] sm:$0xff] (%p79_p3) }
  0x15   : > { %280 = vst [vmem:[%s221_s6 + $0x8] sm:$0xff] %v279_v1  ;;  %v285_v4 = vld [vmem:[%s226_s5 + $0x40] sm:$0xff]  ;;  %v287_v5 = vld [vmem:[%s226_s5 + $0x50] sm:$0xff] }
  0x16   : > { %282 = vst [vmem:[%s221_s6 + $0x10] sm:$0xff] %v281_v2  ;;  %v289_v6 = vld [vmem:[%s226_s5 + $0x60] sm:$0xff]  ;;  %v291_v7 = vld [vmem:[%s226_s5 + $0x70] sm:$0xff] }
  0x17   : > { %284 = vst [vmem:[%s221_s6 + $0x18] sm:$0xff] %v283_v3  ;;  %v293_v8 = vld [vmem:[%s226_s5 + $0x80] sm:$0xff]  ;;  %v295_v9 = vld [vmem:[%s226_s5 + $0x90] sm:$0xff] }
  0x18   : > { %286 = vst [vmem:[%s221_s6 + $0x20] sm:$0xff] %v285_v4  ;;  %v297_v10 = vld [vmem:[%s226_s5 + $0xa0] sm:$0xff]  ;;  %v299_v11 = vld [vmem:[%s226_s5 + $0xb0] sm:$0xff] }
  0x19   : > { %288 = vst [vmem:[%s221_s6 + $0x28] sm:$0xff] %v287_v5 }
  0x1a   : > { %290 = vst [vmem:[%s221_s6 + $0x30] sm:$0xff] %v289_v6 }
  0x1b   : > { %292 = vst [vmem:[%s221_s6 + $0x38] sm:$0xff] %v291_v7 }
  0x1c   : > { %294 = vst [vmem:[%s221_s6 + $0x40] sm:$0xff] %v293_v8 }
  0x1d   : > { %296 = vst [vmem:[%s221_s6 + $0x48] sm:$0xff] %v295_v9 }
  0x1e   : > { %298 = vst [vmem:[%s221_s6 + $0x50] sm:$0xff] %v297_v10 }
  0x1f   : > { %300 = vst [vmem:[%s221_s6 + $0x58] sm:$0xff] %v299_v11 }
  0x20 PF: > { %p1163_p8 = scmp.ge.s32.totalorder %s1274_s19, 1  ;;  %p305_p9 = scmp.lt.s32.totalorder %s1274_s19, 3 }
  0x22   : > { %p306_p10 = pnand %p1163_p8, %p305_p9 }
  0x23   : > { %s312_s7 = sand.u32 (!%p306_p10), 1, %s1258_s15  }
  0x24   : > { %309 = sbr.rel (%p306_p10) target bundleno = 323 (0x143), region = 70  ;;  %s1164_s9 = sshll.u32 (!%p306_p10), %s312_s7, 6 }
  0x25   : > { %s1194_s14 = smul.u32 (!%p306_p10), 96, %s312_s7  ;;  %s1697_s10 = scalar_lea.vmem (!%p306_p10), [#allocation3], %s1164_s9 }
  0x27   : > { %s1370_s21 = scalar_lea.vmem (!%p306_p10), [#allocation2], %s1194_s14 }
  0x29   : > { %v1355_v12 = vld [vmem:[%s1742_s0 + $0x18] sm:$0xff]  ;;  %v1360_v13 = vld [vmem:[%s1742_s0 + $0x20] sm:$0xff]  ;;  %v461_v54 = vld [vmem:[%s1370_s21 + $0x8] sm:$0xff]  ;;  %s1174_s15 = sshll.u32 (%p1336_p6), %s1266_s17, 3 }
  0x2a   : > { %v592_v14 = vld [vmem:[%s1744_s2] sm:$0x7]  ;;  %v408_v15 = vunpack.c.0.s8 %v1355_v12  ;;  %v409_v16 = vunpack.c.0.s8 %v1360_v13  ;;  %v411_v17 = vunpack.c.1.s8 %v1355_v12  ;;  %v412_v20 = vunpack.c.1.s8 %v1360_v13  ;;  %v462_v32 = vld [vmem:[%s1370_s21 + $0x10] sm:$0xff]  ;;  %v465_v0 = vld [vmem:[%s1370_s21 + $0x28] sm:$0xff]  ;;  %s976_s12 = scalar_lea.vmem (%p1336_p6), %s1746_s4, %s1174_s15 }
  0x2b   : > { %594 = vst [vmem:[#allocation1] ss:$9 sm:$0xff] %v592_v14  ;;  %v463_v18 = vld [vmem:[%s1370_s21 + $0x18] sm:$0xff]  ;;  %v466_v38 = vld [vmem:[%s1370_s21 + $0x30] sm:$0xff]  ;;  %v482_v48 = vunpack.c.2.s8 %v462_v32  ;;  %v483_v49 = vunpack.c.3.s8 %v462_v32  ;;  %v480_v57 = vunpack.c.0.s8 %v462_v32  ;;  %v481_v58 = vunpack.c.1.s8 %v462_v32  ;;  %v1414_v5 = vld [vmem:[%s1742_s0 + $0x8] sm:$0xff] }
  0x2c   : > { %v467_v19 = vld [vmem:[%s1370_s21 + $0x38] sm:$0xff]  ;;  %v1375_v21 = vcvt.s32.f32 %v408_v15  ;;  %v1377_v22 = vcvt.s32.f32 %v409_v16  ;;  %v1379_v23 = vcvt.s32.f32 %v411_v17  ;;  %v486_v24 = vunpack.c.2.s8 %v463_v18  ;;  %v460_v16 = vld [vmem:[%s1370_s21] sm:$0xff] }
  0x2d   : > { %v487_v25 = vunpack.c.3.s8 %v463_v18  ;;  %v502_v26 = vunpack.c.2.s8 %v467_v19  ;;  %v503_v27 = vunpack.c.3.s8 %v467_v19  ;;  %v484_v28 = vunpack.c.0.s8 %v463_v18  ;;  %v670_v33 = vld [vmem:[%s1745_s3] sm:$0x7] }
  0x2e   : > { %v485_v29 = vunpack.c.1.s8 %v463_v18  ;;  %v500_v30 = vunpack.c.0.s8 %v467_v19  ;;  %v501_v31 = vunpack.c.1.s8 %v467_v19  ;;  %v534_v34 = vcvt.s32.f32 %v486_v24  ;;  %v1406_v59 = vld [vmem:[%s1742_s0] sm:$0xff] }
  0x2f   : > { %v535_v35 = vcvt.s32.f32 %v487_v25  ;;  %v550_v36 = vcvt.s32.f32 %v502_v26  ;;  %v551_v37 = vcvt.s32.f32 %v503_v27  ;;  %v532_v39 = vcvt.s32.f32 %v484_v28  ;;  %v1432_v28 = vld [vmem:[%s1370_s21 + $0x20] sm:$0xff] }
  0x30   : > { %v533_v40 = vcvt.s32.f32 %v485_v29  ;;  %v548_v41 = vcvt.s32.f32 %v500_v30  ;;  %v549_v42 = vcvt.s32.f32 %v501_v31  ;;  %v498_v52 = vunpack.c.2.s8 %v466_v38 }
  0x31   : > { %v1392_v46 = vpack.c.bf16 %v535_v35, %v534_v34  ;;  %v1394_v47 = vpack.c.bf16 %v551_v37, %v550_v36  ;;  %v499_v53 = vunpack.c.3.s8 %v466_v38  ;;  %v530_v55 = vcvt.s32.f32 %v482_v48 }
  0x32   : > { %v1386_v43 = vld [vmem:[#allocation1] sm:$0xff]  ;;  %v1388_v44 = vld [vmem:[#allocation1 + $0x9] sm:$0xff]  ;;  %v1390_v45 = vld [vmem:[#allocation1 + $0x12] sm:$0xff]  ;;  %v1396_v50 = vpack.c.bf16 %v533_v40, %v532_v39  ;;  %v1398_v51 = vpack.c.bf16 %v549_v42, %v548_v41  ;;  %v531_v56 = vcvt.s32.f32 %v483_v49  ;;  %v546_v60 = vcvt.s32.f32 %v498_v52 }
  0x33   : > { %672 = vst [vmem:[#allocation1] ss:$9 sm:$0xff] %v670_v33  ;;  %1177 = vmatpush.bf16.msra.mxu2 %v1392_v46  ;;  %1185 = vmatpush.bf16.msra.mxu3 %v1394_v47  ;;  %v547_v61 = vcvt.s32.f32 %v499_v53  ;;  %v496_v62 = vunpack.c.0.s8 %v466_v38  ;;  %v497_v63 = vunpack.c.1.s8 %v466_v38  ;;  %v528_v1 = vcvt.s32.f32 %v480_v57 }
  0x34   : > { %724 = vmatpush.bf16.msra.mxu0 %v1392_v46  ;;  %753 = vmatpush.bf16.msra.mxu1 %v1394_v47  ;;  %v529_v2 = vcvt.s32.f32 %v481_v58  ;;  %v478_v3 = vunpack.c.2.s8 %v461_v54  ;;  %v436_v4 = vcvt.s32.f32 %v412_v20  ;;  %v479_v8 = vunpack.c.3.s8 %v461_v54 }
  0x35   : > { %v544_v6 = vcvt.s32.f32 %v496_v62  ;;  %v545_v7 = vcvt.s32.f32 %v497_v63  ;;  %v396_v9 = vunpack.c.0.s8 %v1406_v59  ;;  %v1419_v10 = vpack.c.bf16 %v531_v56, %v530_v55 }
  0x36   : > { %v1421_v11 = vpack.c.bf16 %v547_v61, %v546_v60  ;;  %v494_v14 = vunpack.c.2.s8 %v465_v0  ;;  %v495_v15 = vunpack.c.3.s8 %v465_v0  ;;  %v1426_v17 = vpack.c.bf16 %v529_v2, %v528_v1 }
  0x37   : > { %1178 = vmatpush.bf16.msra.mxu2 %v1396_v50  ;;  %1186 = vmatpush.bf16.msra.mxu3 %v1398_v51  ;;  %v476_v18 = vunpack.c.0.s8 %v461_v54  ;;  %v477_v19 = vunpack.c.1.s8 %v461_v54  ;;  %v397_v20 = vunpack.c.0.s8 %v1414_v5  ;;  %v1429_v24 = vpack.c.bf16 %v545_v7, %v544_v6 }
  0x38   : > { %725 = vmatpush.bf16.msra.mxu0 %v1396_v50  ;;  %754 = vmatpush.bf16.msra.mxu1 %v1398_v51  ;;  %v526_v25 = vcvt.s32.f32 %v478_v3  ;;  %v492_v26 = vunpack.c.0.s8 %v465_v0  ;;  %v493_v27 = vunpack.c.1.s8 %v465_v0  ;;  %v527_v29 = vcvt.s32.f32 %v479_v8  ;;  %v471_v3 = vld [vmem:[%s1370_s21 + $0x58] sm:$0xff] }
  0x39   : > { %v542_v30 = vcvt.s32.f32 %v494_v14  ;;  %v543_v31 = vcvt.s32.f32 %v495_v15  ;;  %v474_v32 = vunpack.c.2.s8 %v460_v16  ;;  %v524_v33 = vcvt.s32.f32 %v476_v18 }
  0x3a   : > { %v525_v34 = vcvt.s32.f32 %v477_v19  ;;  %v540_v35 = vcvt.s32.f32 %v492_v26  ;;  %v475_v36 = vunpack.c.3.s8 %v460_v16  ;;  %v541_v37 = vcvt.s32.f32 %v493_v27  ;;  %v673_v56 = vld [vmem:[#allocation1] sm:$0xff]  ;;  %v674_v61 = vld [vmem:[#allocation1 + $0x9] sm:$0xff] }
  0x3b   : > { %1179 = vmatpush.bf16.msra.mxu2 %v1419_v10  ;;  %1187 = vmatpush.bf16.msra.mxu3 %v1421_v11  ;;  %v522_v38 = vcvt.s32.f32 %v474_v32  ;;  %v490_v39 = vunpack.c.2.s8 %v1432_v28  ;;  %v491_v40 = vunpack.c.3.s8 %v1432_v28  ;;  %v472_v42 = vunpack.c.0.s8 %v460_v16 }
  0x3c   : > { %726 = vmatpush.bf16.msra.mxu0 %v1419_v10  ;;  %755 = vmatpush.bf16.msra.mxu1 %v1421_v11  ;;  %v523_v41 = vcvt.s32.f32 %v475_v36  ;;  %v473_v48 = vunpack.c.1.s8 %v460_v16  ;;  %v399_v49 = vunpack.c.1.s8 %v1406_v59  ;;  %v1441_v52 = vpack.c.bf16 %v527_v29, %v526_v25 }
  0x3d   : > { %v538_v53 = vcvt.s32.f32 %v490_v39  ;;  %v539_v54 = vcvt.s32.f32 %v491_v40  ;;  %v488_v55 = vunpack.c.0.s8 %v1432_v28  ;;  %v1446_v57 = vpack.c.bf16 %v543_v31, %v542_v30 }
  0x3e   : > { %v1448_v58 = vpack.c.bf16 %v525_v34, %v524_v33  ;;  %v1452_v60 = vpack.c.bf16 %v1377_v22, %v1375_v21  ;;  %v400_v62 = vunpack.c.1.s8 %v1414_v5  ;;  %v1457_v63 = vpack.c.bf16 %v541_v37, %v540_v35 }
  0x3f   : > { %1180 = vmatpush.bf16.msra.mxu2 %v1426_v17  ;;  %1188 = vmatpush.bf16.msra.mxu3 %v1429_v24  ;;  %v1459_v0 = vpack.c.bf16 %v523_v41, %v522_v38  ;;  %v489_v1 = vunpack.c.1.s8 %v1432_v28  ;;  %v1463_v2 = vpack.c.bf16 %v436_v4, %v1379_v23  ;;  %v1466_v6 = vpack.c.bf16 %v539_v54, %v538_v53 }
  0x40   : > { %727 = vmatpush.bf16.msra.mxu0 %v1426_v17  ;;  %756 = vmatpush.bf16.msra.mxu1 %v1429_v24  ;;  %v520_v21 = vcvt.s32.f32 %v472_v42  ;;  %v521_v22 = vcvt.s32.f32 %v473_v48  ;;  %v676_v7 = vpack.i.b16 %v673_v56, %v673_v56  ;;  %v536_v8 = vcvt.s32.f32 %v488_v55  ;;  %v470_v48 = vld [vmem:[%s1370_s21 + $0x50] sm:$0xff] }
  0x41   : > { %v619_v14 = vunpack.c.l.bf16 %v1452_v60  ;;  %v622_v15 = vunpack.c.l.bf16 %v1463_v2  ;;  %v679_v16 = vpack.i.b16 %v674_v61, %v674_v61  ;;  %v518_v19 = vunpack.c.2.s8 %v471_v3 }
  0x42   : > { %v678_v18 = vperm.slane %v676_v7, 0  ;;  %v519_v23 = vunpack.c.3.s8 %v471_v3  ;;  %v420_v4 = vcvt.s32.f32 %v396_v9  ;;  %v421_v26 = vcvt.s32.f32 %v397_v20 }
  0x43   : > { %1181 = vmatpush.bf16.msra.mxu2 %v1441_v52  ;;  %1189 = vmatpush.bf16.msra.mxu3 %v1446_v57  ;;  %v681_v25 = vperm.slane %v679_v16, 0  ;;  %v423_v27 = vcvt.s32.f32 %v399_v49  ;;  %v424_v28 = vcvt.s32.f32 %v400_v62  ;;  %v620_v30 = vunpack.c.h.bf16 %v1452_v60 }
  0x44   : > { %728 = vmatpush.bf16.msra.mxu0 %v1441_v52  ;;  %757 = vmatpush.bf16.msra.mxu1 %v1446_v57  ;;  %v1476_v29 = vunpack.c.l.bf16 %v678_v18  ;;  %v623_v31 = vunpack.c.h.bf16 %v1463_v2  ;;  %v516_v32 = vunpack.c.0.s8 %v471_v3  ;;  %v1482_v34 = vpack.c.bf16 %v421_v26, %v420_v4 }
  0x45   : > { %v1480_v33 = vunpack.c.l.bf16 %v681_v25  ;;  %v1484_v9 = vpack.c.bf16 %v424_v28, %v423_v27  ;;  %v517_v35 = vunpack.c.1.s8 %v471_v3  ;;  %v1488_v20 = vpack.c.bf16 %v521_v22, %v520_v21 }
  0x46   : > { %v537_v36 = vcvt.s32.f32 %v489_v1  ;;  %v566_v37 = vcvt.s32.f32 %v518_v19  ;;  %v567_v38 = vcvt.s32.f32 %v519_v23  ;;  %v700_v39 = vmul.f32 %v1476_v29, %v619_v14 }
  0x47   : > { %1182 = vmatpush.bf16.msra.mxu2 %v1448_v58  ;;  %1190 = vmatpush.bf16.msra.mxu3 %v1457_v63  ;;  %v703_v40 = vmul.f32 %v1476_v29, %v622_v15  ;;  %v607_v41 = vunpack.c.l.bf16 %v1482_v34  ;;  %v610_v42 = vunpack.c.l.bf16 %v1484_v9  ;;  %v701_v49 = vmul.f32 %v1480_v33, %v620_v30 }
  0x48   : > { %729 = vmatpush.bf16.msra.mxu0 %v1448_v58  ;;  %758 = vmatpush.bf16.msra.mxu1 %v1457_v63  ;;  %v704_v53 = vmul.f32 %v1480_v33, %v623_v31  ;;  %v608_v54 = vunpack.c.h.bf16 %v1482_v34  ;;  %v611_v55 = vunpack.c.h.bf16 %v1484_v9  ;;  %v564_v62 = vcvt.s32.f32 %v516_v32 }
  0x49   : > { %v688_v56 = vmul.f32 %v1476_v29, %v607_v41  ;;  %v691_v61 = vmul.f32 %v1476_v29, %v610_v42  ;;  %v565_v1 = vcvt.s32.f32 %v517_v35  ;;  %v1517_v3 = vpack.c.bf16 %v537_v36, %v536_v8 }
  0x4a   : > { %v689_v21 = vmul.f32 %v1480_v33, %v608_v54  ;;  %v692_v22 = vmul.f32 %v1480_v33, %v611_v55  ;;  %v514_v7 = vunpack.c.2.s8 %v470_v48  ;;  %v718_v16 = vpack.c.bf16 %v703_v40, %v700_v39  ;;  %v1534_v40 = vld [vmem:[%s1370_s21 + $0x48] sm:$0xff] }
  0x4b   : > { %1183 = vmatpush.bf16.msra.mxu2 %v1459_v0  ;;  %1191 = vmatpush.bf16.msra.mxu3 %v1466_v6  ;;  %v591_v18 = vpack.c.bf16 %v567_v38, %v566_v37  ;;  %v515_v19 = vunpack.c.3.s8 %v470_v48  ;;  %v512_v23 = vunpack.c.0.s8 %v470_v48  ;;  %v719_v8 = vpack.c.bf16 %v704_v53, %v701_v49 }
  0x4c   : > { %730 = vmatpush.bf16.msra.mxu0 %v1459_v0  ;;  %759 = vmatpush.bf16.msra.mxu1 %v1466_v6  ;;  %v513_v4 = vunpack.c.1.s8 %v470_v48  ;;  %v414_v25 = vunpack.c.2.s8 %v1355_v12  ;;  %v415_v26 = vunpack.c.2.s8 %v1360_v13  ;;  %v712_v27 = vpack.c.bf16 %v691_v61, %v688_v56 }
  0x4d   : > { %v590_v28 = vpack.c.bf16 %v565_v1, %v564_v62  ;;  %v417_v32 = vunpack.c.3.s8 %v1355_v12  ;;  %v418_v35 = vunpack.c.3.s8 %v1360_v13  ;;  %v713_v36 = vpack.c.bf16 %v692_v22, %v689_v21 }
  0x4e   : > { %v562_v37 = vcvt.s32.f32 %v514_v7  ;;  %v438_v38 = vcvt.s32.f32 %v414_v25  ;;  %v439_v39 = vcvt.s32.f32 %v415_v26  ;;  %v563_v48 = vcvt.s32.f32 %v515_v19 }
  0x4f   : > { %1184 = vmatpush.bf16.msra.mxu2 %v1488_v20  ;;  %1192 = vmatpush.bf16.msra.mxu3 %v1517_v3  ;;  %v560_v49 = vcvt.s32.f32 %v512_v23  ;;  %v441_v53 = vcvt.s32.f32 %v417_v32  ;;  %v442_v12 = vcvt.s32.f32 %v418_v35  ;;  %v561_v13 = vcvt.s32.f32 %v513_v4 }
  0x50   : > { %731 = vmatpush.bf16.msra.mxu0 %v1488_v20  ;;  %760 = vmatpush.bf16.msra.mxu1 %v1517_v3  ;;  %v1539_v56 = vpack.c.bf16 %v439_v39, %v438_v38  ;;  %v402_v61 = vunpack.c.2.s8 %v1406_v59  ;;  %v403_v62 = vunpack.c.2.s8 %v1414_v5  ;;  %v510_v21 = vunpack.c.2.s8 %v1534_v40 }
  0x51   : > { %v1543_v1 = vpack.c.bf16 %v442_v12, %v441_v53  ;;  %v405_v22 = vunpack.c.3.s8 %v1406_v59  ;;  %v406_v7 = vunpack.c.3.s8 %v1414_v5  ;;  %v589_v4 = vpack.c.bf16 %v563_v48, %v562_v37 }
  0x52   : > { %742 = vmatmul.bf16.vlgmr.msra.gmra.mxu2 %v718_v16  ;;  %771 = vmatmul.bf16.vlgmr.msra.gmra.mxu3 %v719_v8  ;;  %v426_v19 = vcvt.s32.f32 %v402_v61  ;;  %v427_v23 = vcvt.s32.f32 %v403_v62  ;;  %v1750_v16 = vunpack.c.l.bf16 %v1539_v56  ;;  %v1748_v8 = vunpack.c.h.bf16 %v1539_v56 }
  0x53   : > { %782 = vmatpush.bf16.msrb.mxu2 %v591_v18  ;;  %811 = vmatpush.bf16.msrb.mxu3 %v1392_v46  ;;  %v511_v46 = vunpack.c.3.s8 %v1534_v40  ;;  %v429_v25 = vcvt.s32.f32 %v405_v22  ;;  %v1749_v59 = vunpack.c.l.bf16 %v1543_v1  ;;  %v1747_v5 = vunpack.c.h.bf16 %v1543_v1  ;;  %v675_v22 = vld [vmem:[#allocation1 + $0x12] sm:$0xff] }
  0x54   : > { %732 = vmatmul.bf16.vlgmr.msra.gmra.mxu0 %v712_v27  ;;  %761 = vmatmul.bf16.vlgmr.msra.gmra.mxu1 %v713_v36  ;;  %v430_v26 = vcvt.s32.f32 %v406_v7  ;;  %v1555_v27 = vpack.c.bf16 %v427_v23, %v426_v19  ;;  %v588_v32 = vpack.c.bf16 %v561_v13, %v560_v49  ;;  %v558_v35 = vcvt.s32.f32 %v510_v21  ;;  %v1573_v49 = vld [vmem:[%s1742_s0 + $0x10] sm:$0xff]  ;;  %v468_v13 = vld [vmem:[%s1370_s21 + $0x40] sm:$0xff] }
  0x55   : > { %840 = vmatpush.bf16.msrb.mxu0 %v1394_v47  ;;  %869 = vmatpush.bf16.msrb.mxu1 %v591_v18  ;;  %v559_v47 = vcvt.s32.f32 %v511_v46  ;;  %v707_v38 = vmul.f32 %v1480_v33, %v1748_v8  ;;  %v508_v39 = vunpack.c.0.s8 %v1534_v40  ;;  %v509_v48 = vunpack.c.1.s8 %v1534_v40 }
  0x56   : > { %v1557_v18 = vpack.c.bf16 %v430_v26, %v429_v25  ;;  %v613_v36 = vunpack.c.l.bf16 %v1555_v27  ;;  %v614_v37 = vunpack.c.h.bf16 %v1555_v27  ;;  %v398_v21 = vunpack.c.0.s8 %v1573_v49 }
  0x57   : > { %783 = vmatpush.bf16.msrb.mxu2 %v590_v28  ;;  %812 = vmatpush.bf16.msrb.mxu3 %v1396_v50  ;;  %v706_v50 = vmul.f32 %v1476_v29, %v1750_v16  ;;  %v587_v7 = vpack.c.bf16 %v559_v47, %v558_v35  ;;  %v556_v46 = vcvt.s32.f32 %v508_v39  ;;  %v557_v19 = vcvt.s32.f32 %v509_v48 }
  0x58   : > { %v616_v53 = vunpack.c.l.bf16 %v1557_v18  ;;  %v617_v40 = vunpack.c.h.bf16 %v1557_v18  ;;  %v694_v12 = vmul.f32 %v1476_v29, %v613_v36  ;;  %v695_v61 = vmul.f32 %v1480_v33, %v614_v37 }
  0x59   : > { %841 = vmatpush.bf16.msrb.mxu0 %v1398_v51  ;;  %870 = vmatpush.bf16.msrb.mxu1 %v590_v28  ;;  %v709_v51 = vmul.f32 %v1476_v29, %v1749_v59  ;;  %v710_v28 = vmul.f32 %v1480_v33, %v1747_v5  ;;  %v401_v23 = vunpack.c.1.s8 %v1573_v49  ;;  %v506_v26 = vunpack.c.2.s8 %v468_v13 }
  0x5a   : > { %v698_v62 = vmul.f32 %v1480_v33, %v617_v40  ;;  %v507_v5 = vunpack.c.3.s8 %v468_v13  ;;  %v422_v8 = vcvt.s32.f32 %v398_v21  ;;  %v682_v59 = vpack.i.b16 %v675_v22, %v675_v22 }
  0x5b   : > { %784 = vmatpush.bf16.msrb.mxu2 %v589_v4  ;;  %813 = vmatpush.bf16.msrb.mxu3 %v1419_v10  ;;  %v697_v10 = vmul.f32 %v1476_v29, %v616_v53  ;;  %v721_v29 = vpack.c.bf16 %v709_v51, %v706_v50  ;;  %v722_v25 = vpack.c.bf16 %v710_v28, %v707_v38  ;;  %v425_v33 = vcvt.s32.f32 %v401_v23 }
  0x5c   : > { %v598_v16 = vpack.i.b16 %v1386_v43, %v1386_v43  ;;  %v601_v35 = vpack.i.b16 %v1388_v44, %v1388_v44  ;;  %v604_v47 = vpack.i.b16 %v1390_v45, %v1390_v45  ;;  %v554_v50 = vcvt.s32.f32 %v506_v26 }
  0x5d   : > { %842 = vmatpush.bf16.msrb.mxu0 %v1421_v11  ;;  %871 = vmatpush.bf16.msrb.mxu1 %v589_v4  ;;  %v715_v11 = vpack.c.bf16 %v697_v10, %v694_v12  ;;  %v716_v4 = vpack.c.bf16 %v698_v62, %v695_v61  ;;  %v555_v38 = vcvt.s32.f32 %v507_v5  ;;  %v504_v39 = vunpack.c.0.s8 %v468_v13 }
  0x5e   : > { %v505_v48 = vunpack.c.1.s8 %v468_v13  ;;  %v445_v43 = vpack.c.bf16 %v422_v8, %v422_v8  ;;  %v447_v51 = vpack.c.bf16 %v425_v33, %v425_v33  ;;  %v684_v28 = vperm.slane %v682_v59, 0 }
  0x5f   : > { %785 = vmatpush.bf16.msrb.mxu2 %v588_v32  ;;  %814 = vmatpush.bf16.msrb.mxu3 %v1426_v17  ;;  %v586_v17 = vpack.c.bf16 %v557_v19, %v556_v46  ;;  %v600_v44 = vperm.slane %v598_v16, 0  ;;  %v603_v45 = vperm.slane %v601_v35, 0  ;;  %v606_v12 = vperm.slane %v604_v47, 0 }
  0x60   : > { %v553_v5 = vcvt.s32.f32 %v505_v48  ;;  %v612_v13 = vunpack.c.l.bf16 %v447_v51  ;;  %v1611_v10 = vunpack.c.l.bf16 %v684_v28  ;;  %v407_v61 = vunpack.c.3.s8 %v1573_v49 }
  0x61   : > { %843 = vmatpush.bf16.msrb.mxu0 %v1429_v24  ;;  %872 = vmatpush.bf16.msrb.mxu1 %v588_v32  ;;  %v585_v24 = vpack.c.bf16 %v555_v38, %v554_v50  ;;  %v609_v32 = vunpack.c.l.bf16 %v445_v43  ;;  %v631_v8 = vunpack.c.l.bf16 %v600_v44  ;;  %v1613_v59 = vunpack.c.l.bf16 %v603_v45 }
  0x62   : > { %747 = vmatmul.bf16.gmra.mxu2 %v721_v29  ;;  %776 = vmatmul.bf16.gmra.mxu3 %v722_v25  ;;  %v1615_v16 = vunpack.c.l.bf16 %v606_v12  ;;  %v693_v21 = vmul.f32 %v1611_v10, %v612_v13  ;;  %v1752_v48 = vunpack.c.l.bf16 %v1539_v56  ;;  %v1753_v51 = vunpack.c.l.bf16 %v1543_v1 }
  0x63   : > { %786 = vmatpush.bf16.msrb.mxu2 %v587_v7  ;;  %815 = vmatpush.bf16.msrb.mxu3 %v1441_v52  ;;  %v552_v52 = vcvt.s32.f32 %v504_v39  ;;  %v690_v62 = vmul.f32 %v1611_v10, %v609_v32  ;;  %v634_v22 = vmul.f32 %v631_v8, %v607_v41  ;;  %v649_v9 = vmul.f32 %v631_v8, %v622_v15 }
  0x64   : > { %737 = vmatmul.bf16.gmra.mxu0 %v715_v11  ;;  %766 = vmatmul.bf16.gmra.mxu1 %v716_v4  ;;  %v639_v46 = vmul.f32 %v1615_v16, %v612_v13  ;;  %v650_v29 = vmul.f32 %v1613_v59, %v623_v31  ;;  %v640_v60 = vmul.f32 %v631_v8, %v613_v36  ;;  %v1754_v18 = vunpack.c.h.bf16 %v1539_v56 }
  0x65   : > { %844 = vmatpush.bf16.msrb.mxu0 %v1446_v57  ;;  %873 = vmatpush.bf16.msrb.mxu1 %v587_v7  ;;  %v584_v57 = vpack.c.bf16 %v553_v5, %v552_v52  ;;  %v637_v7 = vmul.f32 %v631_v8, %v610_v42  ;;  %v431_v42 = vcvt.s32.f32 %v407_v61  ;;  %v714_v19 = vpack.c.bf16 %v693_v21, %v690_v62 }
  0x66   : > { %v643_v2 = vmul.f32 %v631_v8, %v616_v53  ;;  %v641_v35 = vmul.f32 %v1613_v59, %v614_v37  ;;  %v644_v47 = vmul.f32 %v1613_v59, %v617_v40  ;;  %v652_v43 = vmul.f32 %v631_v8, %v1752_v48 }
  0x67   : > { %787 = vmatpush.bf16.msrb.mxu2 %v586_v17  ;;  %816 = vmatpush.bf16.msrb.mxu3 %v1448_v58  ;;  %v404_v58 = vunpack.c.2.s8 %v1573_v49  ;;  %v636_v49 = vmul.f32 %v1615_v16, %v609_v32  ;;  %v658_v34 = vpack.c.bf16 %v637_v7, %v634_v22  ;;  %v451_v25 = vpack.c.bf16 %v431_v42, %v431_v42 }
  0x68   : > { %v661_v50 = vpack.c.bf16 %v643_v2, %v640_v60  ;;  %v655_v27 = vmul.f32 %v631_v8, %v1753_v51  ;;  %v662_v28 = vpack.c.bf16 %v644_v47, %v641_v35  ;;  %v653_v40 = vmul.f32 %v1613_v59, %v1754_v18 }
  0x69   : > { %845 = vmatpush.bf16.msrb.mxu0 %v1457_v63  ;;  %874 = vmatpush.bf16.msrb.mxu1 %v586_v17  ;;  %v635_v63 = vmul.f32 %v1613_v59, %v608_v54  ;;  %v428_v41 = vcvt.s32.f32 %v404_v58  ;;  %v646_v54 = vmul.f32 %v631_v8, %v619_v14  ;;  %v660_v23 = vpack.c.bf16 %v639_v46, %v636_v49 }
  0x6a   : > { %v618_v33 = vunpack.c.l.bf16 %v451_v25  ;;  %v667_v44 = vpack.c.bf16 %v655_v27, %v652_v43  ;;  %v1755_v45 = vunpack.c.h.bf16 %v1543_v1 }
  0x6b   : > { %788 = vmatpush.bf16.msrb.mxu2 %v585_v24  ;;  %817 = vmatpush.bf16.msrb.mxu3 %v1459_v0  ;;  %v638_v0 = vmul.f32 %v1613_v59, %v611_v55  ;;  %v449_v14 = vpack.c.bf16 %v428_v41, %v428_v41 }
  0x6c   : > { %v699_v11 = vmul.f32 %v1611_v10, %v618_v33  ;;  %v645_v36 = vmul.f32 %v1615_v16, %v618_v33  ;;  %v656_v12 = vmul.f32 %v1613_v59, %v1755_v45 }
  0x6d   : > { %846 = vmatpush.bf16.msrb.mxu0 %v1466_v6  ;;  %875 = vmatpush.bf16.msrb.mxu1 %v585_v24  ;;  %v659_v55 = vpack.c.bf16 %v638_v0, %v635_v63  ;;  %v664_v6 = vpack.c.bf16 %v649_v9, %v646_v54  ;;  %v615_v15 = vunpack.c.l.bf16 %v449_v14 }
  0x6e   : > { %v668_v5 = vpack.c.bf16 %v656_v12, %v653_v40 }
  0x6f   : > { %789 = vmatpush.bf16.msrb.mxu2 %v584_v57  ;;  %818 = vmatpush.bf16.msrb.mxu3 %v1488_v20  ;;  %v647_v20 = vmul.f32 %v1613_v59, %v620_v30  ;;  %v696_v31 = vmul.f32 %v1611_v10, %v615_v15  ;;  %v642_v17 = vmul.f32 %v1615_v16, %v615_v15 }
  0x71   : > { %847 = vmatpush.bf16.msrb.mxu0 %v1517_v3  ;;  %876 = vmatpush.bf16.msrb.mxu1 %v584_v57  ;;  %v665_v26 = vpack.c.bf16 %v650_v29, %v647_v20  ;;  %v395_v3 = vld [vmem:[%s1742_s0 + $0x28] sm:$0xff]  ;;  %v717_v38 = vpack.c.bf16 %v699_v11, %v696_v31  ;;  %v663_v37 = vpack.c.bf16 %v645_v36, %v642_v17 }
  0x72   : > { %790 = vmatmul.bf16.vlgmr.msrb.gmra.mxu2 %v714_v19  ;;  %819 = vmatmul.bf16.vlgmr.msrb.gmra.mxu3 %v658_v34  ;;  %v410_v30 = vunpack.c.0.s8 %v395_v3  ;;  %v413_v4 = vunpack.c.1.s8 %v395_v3  ;;  %v416_v56 = vunpack.c.2.s8 %v395_v3  ;;  %v419_v58 = vunpack.c.3.s8 %v395_v3 }
  0x74   : > { %848 = vmatmul.bf16.vlgmr.msrb.gmra.mxu0 %v659_v55  ;;  %877 = vmatmul.bf16.vlgmr.msrb.gmra.mxu1 %v660_v23  ;;  %v434_v53 = vcvt.s32.f32 %v410_v30  ;;  %v437_v39 = vcvt.s32.f32 %v413_v4  ;;  %v440_v62 = vcvt.s32.f32 %v416_v56  ;;  %v443_v21 = vcvt.s32.f32 %v419_v58 }
  0x76   : > { %v453_v24 = vpack.c.bf16 %v434_v53, %v434_v53  ;;  %v455_v52 = vpack.c.bf16 %v437_v39, %v437_v39  ;;  %v457_v7 = vpack.c.bf16 %v440_v62, %v440_v62  ;;  %v459_v63 = vpack.c.bf16 %v443_v21, %v443_v21 }
  0x78   : > { %v621_v32 = vunpack.c.l.bf16 %v453_v24  ;;  %v624_v13 = vunpack.c.l.bf16 %v455_v52  ;;  %v627_v0 = vunpack.c.l.bf16 %v457_v7  ;;  %v630_v49 = vunpack.c.l.bf16 %v459_v63 }
  0x7a   : > { %v702_v8 = vmul.f32 %v1611_v10, %v621_v32  ;;  %v705_v57 = vmul.f32 %v1611_v10, %v624_v13  ;;  %v648_v61 = vmul.f32 %v1615_v16, %v621_v32  ;;  %v651_v1 = vmul.f32 %v1615_v16, %v624_v13 }
  0x7b   : > { %v708_v46 = vmul.f32 %v1611_v10, %v627_v0  ;;  %v711_v41 = vmul.f32 %v1611_v10, %v630_v49  ;;  %v654_v42 = vmul.f32 %v1615_v16, %v627_v0  ;;  %v657_v19 = vmul.f32 %v1615_v16, %v630_v49 }
  0x7c   : > { %v720_v59 = vpack.c.bf16 %v705_v57, %v702_v8  ;;  %v666_v22 = vpack.c.bf16 %v651_v1, %v648_v61 }
  0x7d   : > { %v723_v34 = vpack.c.bf16 %v711_v41, %v708_v46  ;;  %v669_v54 = vpack.c.bf16 %v657_v19, %v654_v42 }
  0x82   : > { %795 = vmatmul.bf16.gmra.mxu2 %v717_v38  ;;  %824 = vmatmul.bf16.gmra.mxu3 %v661_v50 }
  0x84   : > { %853 = vmatmul.bf16.gmra.mxu0 %v662_v28  ;;  %882 = vmatmul.bf16.gmra.mxu1 %v663_v37 }
  0x92   : > { %800 = vmatmul.bf16.gmra.mxu2 %v720_v59  ;;  %829 = vmatmul.bf16.gmra.mxu3 %v664_v6 }
  0x94   : > { %858 = vmatmul.bf16.gmra.mxu0 %v665_v26  ;;  %887 = vmatmul.bf16.gmra.mxu1 %v666_v22 }
  0xa2   : > { %805 = vmatmul.bf16.gmra.mxu2 %v723_v34  ;;  %834 = vmatmul.bf16.gmra.mxu3 %v667_v44 }
  0xa4   : > { %863 = vmatmul.bf16.gmra.mxu0 %v668_v5  ;;  %892 = vmatmul.bf16.gmra.mxu1 %v669_v54 }
  0xd1   : > { %v733_v9 = vpop.f32.mrf.mxu0  ;;  %v762_v55 = vpop.f32.mrf.mxu1 }
  0xd2   : > { %v763_v11 = vadd.f32 %v762_v55, %v733_v9 }
  0xd5   : > { %v743_v23 = vpop.f32.mrf.mxu2  ;;  %v772_v6 = vpop.f32.mrf.mxu3 }
  0xd6   : > { %v773_v46 = vadd.f32 %v772_v6, %v743_v23 }
  0xd9   : > { %v735_v20 = vpop.f32.mrf.mxu0  ;;  %v764_v29 = vpop.f32.mrf.mxu1 }
  0xda   : > { %v765_v38 = vadd.f32 %v764_v29, %v735_v20 }
  0xdd   : > { %v1683_v14 = vpop.f32.mrf.mxu2  ;;  %v1685_v25 = vpop.f32.mrf.mxu3 }
  0xe1   : > { %v738_v10 = vpop.f32.mrf.mxu0  ;;  %v767_v26 = vpop.f32.mrf.mxu1 }
  0xe2   : > { %v768_v45 = vadd.f32 %v767_v26, %v738_v10  ;;  %v775_v10 = vadd.f32 %v1685_v25, %v1683_v14 }
  0xe5   : > { %v1687_v15 = vpop.f32.mrf.mxu2  ;;  %v1689_v16 = vpop.f32.mrf.mxu3 }
  0xe9   : > { %v740_v33 = vpop.f32.mrf.mxu0  ;;  %v769_v3 = vpop.f32.mrf.mxu1 }
  0xea   : > { %v770_v61 = vadd.f32 %v769_v3, %v740_v33 }
  0xed   : > { %v1691_v60 = vpop.f32.mrf.mxu2  ;;  %v1693_v2 = vpop.f32.mrf.mxu3 }
  0xf1   : > { %v849_v30 = vpop.f32.mrf.mxu0  ;;  %v878_v31 = vpop.f32.mrf.mxu1 }
  0xf5   : > { %v791_v4 = vpop.f32.mrf.mxu2  ;;  %v820_v35 = vpop.f32.mrf.mxu3 }
  0xf6   : > { %v792_v47 = vadd.f32 %v791_v4, %v763_v11 }
  0xf8   : > { %v821_v17 = vadd.f32 %v820_v35, %v792_v47  ;;  %v778_v47 = vadd.f32 %v1689_v16, %v1687_v15 }
  0xf9   : > { %v851_v36 = vpop.f32.mrf.mxu0  ;;  %v880_v50 = vpop.f32.mrf.mxu1 }
  0xfa   : > { %v850_v53 = vadd.f32 %v849_v30, %v821_v17 }
  0xfc   : > { %v879_v39 = vadd.f32 %v878_v31, %v850_v53 }
  0xfd   : > { %v793_v48 = vpop.f32.mrf.mxu2  ;;  %v822_v43 = vpop.f32.mrf.mxu3 }
  0xfe   : > { %v794_v51 = vadd.f32 %v793_v48, %v765_v38  ;;  %v933_v27 = vmul.f32 0.0033333334, %v879_v39 }
 0x100   : > { %v823_v28 = vadd.f32 %v822_v43, %v794_v51  ;;  %v1165_v18 = vclamps-f32 %v933_v27, 1.0  ;;  %v780_v51 = vadd.f32 %v1693_v2, %v1691_v60 }
 0x101   : > { %v854_v37 = vpop.f32.mrf.mxu0  ;;  %v883_v44 = vpop.f32.mrf.mxu1 }
 0x102   : > { %v852_v40 = vadd.f32 %v851_v36, %v823_v28  ;;  %957 = vst [vmem:[%s1697_s10] sm:$0xff] %v1165_v18 }
 0x104   : > { %v881_v12 = vadd.f32 %v880_v50, %v852_v40 }
 0x105   : > { %v796_v24 = vpop.f32.mrf.mxu2  ;;  %v825_v52 = vpop.f32.mrf.mxu3 }
 0x106   : > { %v797_v5 = vadd.f32 %v796_v24, %v768_v45  ;;  %v934_v32 = vmul.f32 0.0033333334, %v881_v12 }
 0x108   : > { %v826_v13 = vadd.f32 %v825_v52, %v797_v5  ;;  %v1166_v57 = vclamps-f32 %v934_v32, 1.0 }
 0x109   : > { %v856_v8 = vpop.f32.mrf.mxu0  ;;  %v885_v58 = vpop.f32.mrf.mxu1  ;;  %v1019_v60 = vld [vmem:[%s1697_s10] sm:$0xff] (%p1336_p6) }
 0x10a   : > { %v855_v56 = vadd.f32 %v854_v37, %v826_v13  ;;  %958 = vst [vmem:[%s1697_s10 + $0x8] sm:$0xff] %v1166_v57 }
 0x10b   : > { %1020 = vst [vmem:[%s976_s12] sm:$0xff] (%p1336_p6), %v1019_v60 }
 0x10c   : > { %v884_v1 = vadd.f32 %v883_v44, %v855_v56 }
 0x10d   : > { %v798_v59 = vpop.f32.mrf.mxu2  ;;  %v827_v62 = vpop.f32.mrf.mxu3 }
 0x10e   : > { %v799_v21 = vadd.f32 %v798_v59, %v770_v61  ;;  %v935_v22 = vmul.f32 0.0033333334, %v884_v1 }
 0x110   : > { %v828_v7 = vadd.f32 %v827_v62, %v799_v21  ;;  %v1167_v63 = vclamps-f32 %v935_v22, 1.0 }
 0x111   : > { %v859_v49 = vpop.f32.mrf.mxu0  ;;  %v888_v42 = vpop.f32.mrf.mxu1  ;;  %v1021_v2 = vld [vmem:[%s1697_s10 + $0x8] sm:$0xff] (%p1336_p6) }
 0x112   : > { %v857_v0 = vadd.f32 %v856_v8, %v828_v7  ;;  %959 = vst [vmem:[%s1697_s10 + $0x10] sm:$0xff] %v1167_v63 }
 0x113   : > { %1022 = vst [vmem:[%s976_s12 + $0x10] sm:$0xff] (%p1336_p6), %v1021_v2 }
 0x114   : > { %v886_v41 = vadd.f32 %v885_v58, %v857_v0 }
 0x115   : > { %v801_v19 = vpop.f32.mrf.mxu2  ;;  %v830_v34 = vpop.f32.mrf.mxu3 }
 0x116   : > { %v802_v54 = vadd.f32 %v801_v19, %v773_v46  ;;  %v936_v9 = vmul.f32 0.0033333334, %v886_v41 }
 0x118   : > { %v831_v55 = vadd.f32 %v830_v34, %v802_v54  ;;  %v1168_v20 = vclamps-f32 %v936_v9, 1.0 }
 0x119   : > { %v861_v33 = vpop.f32.mrf.mxu0  ;;  %v890_v6 = vpop.f32.mrf.mxu1  ;;  %v1023_v32 = vld [vmem:[%s1697_s10 + $0x10] sm:$0xff] (%p1336_p6) }
 0x11a   : > { %v860_v29 = vadd.f32 %v859_v49, %v831_v55  ;;  %960 = vst [vmem:[%s1697_s10 + $0x18] sm:$0xff] %v1168_v20 }
 0x11b   : > { %1024 = vst [vmem:[%s976_s12 + $0x20] sm:$0xff] (%p1336_p6), %v1023_v32 }
 0x11c   : > { %v889_v26 = vadd.f32 %v888_v42, %v860_v29 }
 0x11d   : > { %v803_v3 = vpop.f32.mrf.mxu2  ;;  %v832_v30 = vpop.f32.mrf.mxu3 }
 0x11e   : > { %v804_v23 = vadd.f32 %v803_v3, %v775_v10  ;;  %v937_v31 = vmul.f32 0.0033333334, %v889_v26 }
 0x120   : > { %v833_v11 = vadd.f32 %v832_v30, %v804_v23  ;;  %v1169_v4 = vclamps-f32 %v937_v31, 1.0 }
 0x121   : > { %v864_v25 = vpop.f32.mrf.mxu0  ;;  %v893_v39 = vpop.f32.mrf.mxu1  ;;  %v1025_v13 = vld [vmem:[%s1697_s10 + $0x18] sm:$0xff] (%p1336_p6) }
 0x122   : > { %v862_v35 = vadd.f32 %v861_v33, %v833_v11  ;;  %961 = vst [vmem:[%s1697_s10 + $0x20] sm:$0xff] %v1169_v4 }
 0x123   : > { %1026 = vst [vmem:[%s976_s12 + $0x30] sm:$0xff] (%p1336_p6), %v1025_v13 }
 0x124   : > { %v891_v17 = vadd.f32 %v890_v6, %v862_v35 }
 0x125   : > { %v806_v36 = vpop.f32.mrf.mxu2  ;;  %v835_v50 = vpop.f32.mrf.mxu3 }
 0x126   : > { %v807_v14 = vadd.f32 %v806_v36, %v778_v47  ;;  %v938_v53 = vmul.f32 0.0033333334, %v891_v17 }
 0x128   : > { %v836_v38 = vadd.f32 %v835_v50, %v807_v14  ;;  %v1170_v48 = vclamps-f32 %v938_v53, 1.0 }
 0x129   : > { %v866_v18 = vpop.f32.mrf.mxu0  ;;  %v895_v12 = vpop.f32.mrf.mxu1  ;;  %v1027_v8 = vld [vmem:[%s1697_s10 + $0x20] sm:$0xff] (%p1336_p6) }
 0x12a   : > { %v865_v43 = vadd.f32 %v864_v25, %v836_v38  ;;  %962 = vst [vmem:[%s1697_s10 + $0x28] sm:$0xff] %v1170_v48 }
 0x12b   : > { %1028 = vst [vmem:[%s976_s12 + $0x40] sm:$0xff] (%p1336_p6), %v1027_v8 }
 0x12c   : > { %v894_v27 = vadd.f32 %v893_v39, %v865_v43 }
 0x12d   : > { %v808_v28 = vpop.f32.mrf.mxu2  ;;  %v837_v16 = vpop.f32.mrf.mxu3 }
 0x12e   : > { %v809_v15 = vadd.f32 %v808_v28, %v780_v51  ;;  %v939_v37 = vmul.f32 0.0033333334, %v894_v27 }
 0x130   : > { %v838_v44 = vadd.f32 %v837_v16, %v809_v15  ;;  %v1171_v40 = vclamps-f32 %v939_v37, 1.0 }
 0x131   : > { %v1029_v57 = vld [vmem:[%s1697_s10 + $0x28] sm:$0xff] (%p1336_p6) }
 0x132   : > { %v867_v45 = vadd.f32 %v866_v18, %v838_v44  ;;  %963 = vst [vmem:[%s1697_s10 + $0x30] sm:$0xff] %v1171_v40 }
 0x133   : > { %1030 = vst [vmem:[%s976_s12 + $0x50] sm:$0xff] (%p1336_p6), %v1029_v57 }
 0x134   : > { %v896_v24 = vadd.f32 %v895_v12, %v867_v45 }
 0x136   : > { %v940_v52 = vmul.f32 0.0033333334, %v896_v24  ;;  %971 = sbr.rel (!%p1336_p6) target bundleno = 323 (0x143), region = 86 }
 0x138   : > { %v1172_v5 = vclamps-f32 %v940_v52, 1.0 }
 0x139   : > { %v1031_v56 = vld [vmem:[%s1697_s10 + $0x30] sm:$0xff] (%p1336_p6) }
 0x13a   : > { %964 = vst [vmem:[%s1697_s10 + $0x38] sm:$0xff] %v1172_v5 }
 0x13b   : > { %1032 = vst [vmem:[%s976_s12 + $0x60] sm:$0xff] %v1031_v56 }
 0x141   : > { %v1033_v58 = vld [vmem:[%s1697_s10 + $0x38] sm:$0xff] }
 0x142   : > { %1034 = vst [vmem:[%s976_s12 + $0x70] sm:$0xff] %v1033_v58 }
 0x143 PF: > { %s14_s19 = sadd.s32 1, %s1274_s19   ;;  %s1756_s15 = smov %s1262_s16 }
 0x144   : > { %p11_p11 = scmp.ge.s32.totalorder %s14_s19, 4   ;;  %s1757_s16 = smov %s1341_s25 }
 0x145   : > { %s1758_s17 = smov %s1270_s18  ;;  %s1759_s18 = smov %s1761_s20 }
 0x146   :  { %13 = sbr.rel (!%p11_p11) target bundleno = 3 (0x3), region = 164 }

</bundles_post_ra>
